<compile_context>
chip_gen: v7x
topology: tpu7x:2x2x1
jax: 0.10.0
libtpu: 0.0.40
codegen_flags: <defaults>
</compile_context>

<pallas_src>
import functools

import jax
import jax.numpy as jnp
from jax.experimental import pallas as pl
from jax.experimental.pallas import tpu as pltpu


# ----------------------------------------------------------------------------
# Hardware-aware configuration
# ----------------------------------------------------------------------------
def _vmem_limit_bytes():
    """~80% of the physical VMEM of the local TPU generation (fallback 128 MiB)."""
    cap = 128 * 1024 * 1024
    try:
        info = pltpu.get_tpu_info()
        cap = int(getattr(info, "vmem_capacity_bytes", cap))
    except Exception:
        pass
    return int(cap * 0.8)


_VMEM_LIMIT = _vmem_limit_bytes()
_BIG_VMEM = _VMEM_LIMIT >= 96 * 1024 * 1024          # v5e / v6e (128 MiB physical)
_MM_TM, _MM_TN, _MM_TK = (512, 512, 1024) if _BIG_VMEM else (256, 256, 512)
_MLP_TM = 512 if _BIG_VMEM else 256
_MLP_TH = 2048 if _BIG_VMEM else 1024


# Approximate reciprocal on the EUP slot when available (frees the VALU slot).
if hasattr(pl, "reciprocal"):
    def _recip(x):
        return pl.reciprocal(x, approx=True)
else:                                                 # older JAX fallback
    def _recip(x):
        return 1.0 / x


def _round_up(x, m):
    return ((x + m - 1) // m) * m


def _pick_divisor(dim, cap, align):
    """Largest tile <= cap, multiple of `align`, that divides `dim`; else full dim."""
    if dim <= cap:
        return dim
    t = (cap // align) * align
    while t >= align:
        if dim % t == 0:
            return t
        t -= align
    return dim


def _probe_buffered_one():
    """Return pl.Buffered(1) if pipeline_mode=Buffered(1) compiles & runs here."""
    if not hasattr(pl, "Buffered"):
        return None
    try:
        mode = pl.Buffered(1)
        spec = pl.BlockSpec((8, 128), lambda i: (0, 0), pipeline_mode=mode)

        def _k(x_ref, o_ref):
            o_ref[...] = x_ref[...] + 1.0

        f = pl.pallas_call(
            _k,
            out_shape=jax.ShapeDtypeStruct((16, 128), jnp.float32),
            grid=(2,),
            in_specs=[spec],
            out_specs=pl.BlockSpec((8, 128), lambda i: (i, 0)),
        )
        jax.block_until_ready(f(jnp.zeros((8, 128), jnp.float32)))
        return mode
    except Exception:
        return None


_BUFFERED_ONE = _probe_buffered_one()


def _const_spec(shape):
    """BlockSpec for an operand whose block index never changes (weights/biases).

    Single-buffered when supported: constant-index operands do not need the
    default double buffer, halving their resident VMEM.
    """
    idx = lambda *_: (0,) * len(shape)
    if _BUFFERED_ONE is not None:
        return pl.BlockSpec(shape, idx, pipeline_mode=_BUFFERED_ONE)
    return pl.BlockSpec(shape, idx)


def _ln_f32(x, g, b, eps=1e-5):
    """LayerNorm math in f32.  x: (rows, D); g/b: (1, D)."""
    mean = jnp.mean(x, axis=-1, keepdims=True)
    xc = x - mean
    var = jnp.mean(xc * xc, axis=-1, keepdims=True)
    return (xc * jax.lax.rsqrt(var + eps)) * g + b


# ----------------------------------------------------------------------------
# Tiled, K-accumulating matmul (patch-embedding GEMM)
# ----------------------------------------------------------------------------
def _matmul_kernel(a_ref, b_ref, o_ref, acc_ref):
    @pl.when(pl.program_id(2) == 0)
    def _():
        acc_ref[...] = jnp.zeros_like(acc_ref)

    acc_ref[...] += jnp.dot(a_ref[...], b_ref[...],
                            preferred_element_type=jnp.float32)

    @pl.when(pl.program_id(2) == pl.num_programs(2) - 1)
    def _():
        o_ref[...] = acc_ref[...].astype(o_ref.dtype)


def matmul(a, b, *, out_dtype=jnp.bfloat16, tm=None, tn=None, tk=None):
    """(M, K) @ (K, N) -> (M, N); pads to tile multiples (zero pad is exact)."""
    M, K = a.shape
    K2, N = b.shape
    assert K == K2
    tm = min(_MM_TM if tm is None else tm, _round_up(M, 8))
    tn = min(_MM_TN if tn is None else tn, _round_up(N, 128))
    tk = min(_MM_TK if tk is None else tk, _round_up(K, 128))
    Mp, Np, Kp = _round_up(M, tm), _round_up(N, tn), _round_up(K, tk)
    if (Mp, Kp) != (M, K):
        a = jnp.pad(a, ((0, Mp - M), (0, Kp - K)))
    if (Kp, Np) != (K, N):
        b = jnp.pad(b, ((0, Kp - K), (0, Np - N)))
    out = pl.pallas_call(
        _matmul_kernel,
        out_shape=jax.ShapeDtypeStruct((Mp, Np), out_dtype),
        grid=(Mp // tm, Np // tn, Kp // tk),
        in_specs=[pl.BlockSpec((tm, tk), lambda i, j, k: (i, k)),
                  pl.BlockSpec((tk, tn), lambda i, j, k: (k, j))],
        out_specs=pl.BlockSpec((tm, tn), lambda i, j, k: (i, j)),
        scratch_shapes=[pltpu.VMEM((tm, tn), jnp.float32)],
        compiler_params=pltpu.CompilerParams(
            dimension_semantics=("parallel", "parallel", "arbitrary"),
            vmem_limit_bytes=_VMEM_LIMIT),
    )(a, b)
    if (Mp, Np) != (M, N):
        out = out[:M, :N]
    return out


# ----------------------------------------------------------------------------
# Row-tiled LayerNorm (ln_pre)
# ----------------------------------------------------------------------------
def _layernorm_kernel(x_ref, g_ref, b_ref, o_ref):
    x = x_ref[...].astype(jnp.float32)
    o_ref[...] = _ln_f32(x, g_ref[...], b_ref[...]).astype(o_ref.dtype)


def layernorm(x, gamma, beta, *, out_dtype=jnp.float32, tm=512):
    M, D = x.shape
    tm = min(tm, _round_up(M, 8))
    Mp = _round_up(M, tm)
    xp = jnp.pad(x, ((0, Mp - M), (0, 0))) if Mp != M else x
    out = pl.pallas_call(
        _layernorm_kernel,
        out_shape=jax.ShapeDtypeStruct((Mp, D), out_dtype),
        grid=(Mp // tm,),
        in_specs=[pl.BlockSpec((tm, D), lambda i: (i, 0)),
                  _const_spec((1, D)),
                  _const_spec((1, D))],
        out_specs=pl.BlockSpec((tm, D), lambda i: (i, 0)),
        compiler_params=pltpu.CompilerParams(
            dimension_semantics=("parallel",),
            vmem_limit_bytes=_VMEM_LIMIT),
    )(xp, gamma, beta)
    return out[:M] if Mp != M else out


# ----------------------------------------------------------------------------
# Fused ln_post + final projection (class token -> output embedding)
# ----------------------------------------------------------------------------
def _ln_proj_kernel(x_ref, g_ref, b_ref, w_ref, o_ref):
    x = x_ref[...].astype(jnp.float32)
    xn = _ln_f32(x, g_ref[...], b_ref[...])
    o_ref[...] = jnp.dot(xn.astype(w_ref.dtype), w_ref[...],
                         preferred_element_type=jnp.float32).astype(o_ref.dtype)


def ln_proj(x, gamma, beta, w, *, out_dtype=jnp.float32, tm=256):
    M, D = x.shape
    N = w.shape[1]
    tm = min(tm, _round_up(M, 8))
    Mp = _round_up(M, tm)
    xp = jnp.pad(x, ((0, Mp - M), (0, 0))) if Mp != M else x
    out = pl.pallas_call(
        _ln_proj_kernel,
        out_shape=jax.ShapeDtypeStruct((Mp, N), out_dtype),
        grid=(Mp // tm,),
        in_specs=[pl.BlockSpec((tm, D), lambda i: (i, 0)),
                  _const_spec((1, D)),
                  _const_spec((1, D)),
                  _const_spec((D, N))],
        out_specs=pl.BlockSpec((tm, N), lambda i: (i, 0)),
        compiler_params=pltpu.CompilerParams(
            dimension_semantics=("parallel",),
            vmem_limit_bytes=_VMEM_LIMIT),
    )(xp, gamma, beta, w)
    return out[:M] if Mp != M else out


# ----------------------------------------------------------------------------
# Fused ln_1 + multi-head self-attention + residual add
# ----------------------------------------------------------------------------
def _attn_block_kernel(x_ref, g_ref, b_ref, wqkv_ref, bqkv_ref, wo_ref, bo_ref,
                       o_ref, q_sc, k_sc, v_sc, ctx_sc,
                       *, num_heads, seq_valid):
    x = x_ref[0].astype(jnp.float32)                   # (S, D) residual input
    S, D = x.shape
    Dh = D // num_heads
    cdt = wqkv_ref.dtype                               # bf16 MXU compute dtype

    # ln_1 in f32
    xn = _ln_f32(x, g_ref[...], b_ref[...])

    # fused QKV projection; the 1/sqrt(Dh) scale is folded into wqkv/bqkv.
    qkv = jnp.dot(xn.astype(cdt), wqkv_ref[...],
                  preferred_element_type=jnp.float32) + bqkv_ref[...]

    # Stash per-head (S, Dh) slices in (H, S, Dh) scratch (static lane slices:
    # cheap copies) so the heavy per-head intermediates live inside a fori_loop.
    for h in range(num_heads):
        q_sc[h] = qkv[:, h * Dh:(h + 1) * Dh].astype(cdt)
        k_sc[h] = qkv[:, D + h * Dh:D + (h + 1) * Dh].astype(cdt)
        v_sc[h] = qkv[:, 2 * D + h * Dh:2 * D + (h + 1) * Dh].astype(cdt)

    if seq_valid < S:   # mask zero-padded key positions (static mask)
        key_valid = jax.lax.broadcasted_iota(jnp.int32, (1, S), 1) < seq_valid

    def head_body(h, carry):
        qh = q_sc[h]                                   # (S, Dh)
        kh = k_sc[h]
        vh = v_sc[h]
        scores = jax.lax.dot_general(qh, kh, (((1,), (1,)), ((), ())),
                                     preferred_element_type=jnp.float32)  # (S,S)
        if seq_valid < S:
            scores = jnp.where(key_valid, scores, -1e30)
        scores = scores - jnp.max(scores, axis=-1, keepdims=True)
        p = jnp.exp(scores)
        denom = jnp.sum(p, axis=-1, keepdims=True)                        # (S,1)
        ctx_h = jnp.dot(p.astype(cdt), vh, preferred_element_type=jnp.float32)
        # deferred softmax normalization: scale (S,Dh) instead of dividing (S,S)
        ctx_sc[h] = (ctx_h * _recip(denom)).astype(cdt)
        return carry

    # fori_loop bounds live ranges: only ONE head's (S,S) scores are live.
    jax.lax.fori_loop(0, num_heads, head_body, 0)

    # reassemble (S, D) context (static lane slices), then one full-width
    # out-projection (K = D fills the MXU) + residual add.
    ctx = jnp.concatenate([ctx_sc[h] for h in range(num_heads)], axis=-1)
    out = jnp.dot(ctx, wo_ref[...], preferred_element_type=jnp.float32) + bo_ref[...]
    o_ref[0] = (x + out).astype(o_ref.dtype)


def attn_block(x, gamma, beta, wqkv, bqkv, wo, bo, *, num_heads, seq_valid):
    """x: (B, S, D).  Fused LN1 + MHA + residual; one batch element per grid step."""
    B, S, D = x.shape
    Dh = D // num_heads
    kernel = functools.partial(_attn_block_kernel, num_heads=num_heads,
                               seq_valid=seq_valid)
    return pl.pallas_call(
        kernel,
        out_shape=jax.ShapeDtypeStruct((B, S, D), x.dtype),
        grid=(B,),
        in_specs=[pl.BlockSpec((1, S, D), lambda b: (b, 0, 0)),
                  _const_spec((1, D)),
                  _const_spec((1, D)),
                  _const_spec((D, 3 * D)),
                  _const_spec((1, 3 * D)),
                  _const_spec((D, D)),
                  _const_spec((1, D))],
        out_specs=pl.BlockSpec((1, S, D), lambda b: (b, 0, 0)),
        scratch_shapes=[pltpu.VMEM((num_heads, S, Dh), wqkv.dtype)] * 4,
        compiler_params=pltpu.CompilerParams(
            dimension_semantics=("parallel",),
            vmem_limit_bytes=_VMEM_LIMIT),
    )(x, gamma, beta, wqkv, bqkv, wo, bo)


# ----------------------------------------------------------------------------
# Fused ln_2 + MLP (QuickGELU) + residual add, row tiled + hidden-dim reduction
# ----------------------------------------------------------------------------
def _mlp_block_kernel(x_ref, g_ref, b_ref, w1_ref, b1_ref, w2_ref, b2_ref,
                      o_ref, acc_ref):
    j = pl.program_id(1)                               # hidden-tile (reduction) axis

    @pl.when(j == 0)
    def _():
        acc_ref[...] = jnp.zeros_like(acc_ref)

    x = x_ref[...].astype(jnp.float32)                 # (tm, D) residual input
    cdt = w1_ref.dtype
    xn = _ln_f32(x, g_ref[...], b_ref[...])            # recomputed per tile (cheap)
    h = jnp.dot(xn.astype(cdt), w1_ref[...],
                preferred_element_type=jnp.float32) + b1_ref[...]
    h = h * jax.nn.sigmoid(1.702 * h)                  # QuickGELU, f32 math
    acc_ref[...] += jnp.dot(h.astype(cdt), w2_ref[...],
                            preferred_element_type=jnp.float32)

    @pl.when(j == pl.num_programs(1) - 1)
    def _():
        o_ref[...] = (x + acc_ref[...] + b2_ref[...]).astype(o_ref.dtype)


def mlp_block(x, gamma, beta, w1, b1, w2, b2, *, tm=None, th=None):
    """x: (M, D); w1: (D, 4D); w2: (4D, D).  Hidden dim tiled & accumulated."""
    M, D = x.shape
    Hdim = w1.shape[1]
    tm = min(_MLP_TM if tm is None else tm, _round_up(M, 8))
    th = _pick_divisor(Hdim, _MLP_TH if th is None else th, 128)
    Mp = _round_up(M, tm)
    xp = jnp.pad(x, ((0, Mp - M), (0, 0))) if Mp != M else x
    out = pl.pallas_call(
        _mlp_block_kernel,
        out_shape=jax.ShapeDtypeStruct((Mp, D), x.dtype),
        grid=(Mp // tm, Hdim // th),
        in_specs=[pl.BlockSpec((tm, D), lambda i, j: (i, 0)),
                  _const_spec((1, D)),
                  _const_spec((1, D)),
                  pl.BlockSpec((D, th), lambda i, j: (0, j)),
                  pl.BlockSpec((1, th), lambda i, j: (0, j)),
                  pl.BlockSpec((th, D), lambda i, j: (j, 0)),
                  _const_spec((1, D))],
        out_specs=pl.BlockSpec((tm, D), lambda i, j: (i, 0)),
        scratch_shapes=[pltpu.VMEM((tm, D), jnp.float32)],
        compiler_params=pltpu.CompilerParams(
            dimension_semantics=("parallel", "arbitrary"),
            vmem_limit_bytes=_VMEM_LIMIT),
    )(xp, gamma, beta, w1, b1, w2, b2)
    return out[:M] if Mp != M else out


# ----------------------------------------------------------------------------
# Parameter initialization (deterministic, synthetic — mirrors CLIP visual shapes)
# Matmul weights stored pre-transposed (in_features, out_features) in bf16;
# biases and LayerNorm parameters stay f32.  The attention 1/sqrt(Dh) scale is
# folded into the Q columns of wqkv / bqkv here (one-time constant transform).
# ----------------------------------------------------------------------------
def init_params(key, *, width, layers, heads, patch_size, in_ch, prefix_len,
                output_dim):
    keys = jax.random.split(key, 4 + layers)
    scale = width ** -0.5
    q_scale = (width // heads) ** -0.5
    wdt = jnp.bfloat16
    params = dict(
        conv1=(0.02 * jax.random.normal(
            keys[0], (width, in_ch, patch_size, patch_size), jnp.float32)).astype(wdt),
        class_embedding=scale * jax.random.normal(keys[1], (width,), jnp.float32),
        positional_embedding=scale * jax.random.normal(keys[2], (prefix_len, width), jnp.float32),
        ln_pre_g=jnp.ones((1, width), jnp.float32),
        ln_pre_b=jnp.zeros((1, width), jnp.float32),
        ln_post_g=jnp.ones((1, width), jnp.float32),
        ln_post_b=jnp.zeros((1, width), jnp.float32),
        proj=(scale * jax.random.normal(keys[3], (width, output_dim), jnp.float32)).astype(wdt),
        blocks=[],
    )
    for l in range(layers):
        bk = jax.random.split(keys[4 + l], 4)
        wqkv = 0.02 * jax.random.normal(bk[0], (width, 3 * width), jnp.float32)
        wqkv = wqkv.at[:, :width].multiply(q_scale)         # fold 1/sqrt(Dh) into Q
        bqkv = jnp.zeros((1, 3 * width), jnp.float32)
        bqkv = bqkv.at[:, :width].multiply(q_scale)          # (zeros; kept for clarity)
        params['blocks'].append(dict(
            ln1_g=jnp.ones((1, width), jnp.float32),
            ln1_b=jnp.zeros((1, width), jnp.float32),
            ln2_g=jnp.ones((1, width), jnp.float32),
            ln2_b=jnp.zeros((1, width), jnp.float32),
            wqkv=wqkv.astype(wdt),
            bqkv=bqkv,
            wo=(0.02 * jax.random.normal(bk[1], (width, width), jnp.float32)).astype(wdt),
            bo=jnp.zeros((1, width), jnp.float32),
            w1=(0.02 * jax.random.normal(bk[2], (width, 4 * width), jnp.float32)).astype(wdt),
            b1=jnp.zeros((1, 4 * width), jnp.float32),
            w2=(0.02 * jax.random.normal(bk[3], (4 * width, width), jnp.float32)).astype(wdt),
            b2=jnp.zeros((1, width), jnp.float32),
        ))
    return params


# ----------------------------------------------------------------------------
# Forward pass (mirrors VisionEncoder.forward with parallel=False)
# ----------------------------------------------------------------------------
def vision_encoder_forward(x, prompt, params, *, patch_size, num_heads):
    cdt = jnp.bfloat16
    B, C, H, W = x.shape
    P = patch_size
    gh, gw = H // P, W // P
    D = params['class_embedding'].shape[0]
    prefix_len = params['positional_embedding'].shape[0]

    # conv1 (stride = kernel = patch_size) as im2col + tiled Pallas GEMM;
    # matmul() pads the contraction K up to the tile internally (exact: zero pad).
    patches = (x.reshape(B, C, gh, P, gw, P)
                 .transpose(0, 2, 4, 1, 3, 5)
                 .reshape(B * gh * gw, C * P * P))
    w_conv = params['conv1'].reshape(D, C * P * P).T          # (C*P*P, width)
    x_emb = matmul(patches.astype(cdt), w_conv.astype(cdt),
                   out_dtype=jnp.float32).reshape(B, gh * gw, D)

    # prepend class token, add positional embedding (f32 glue)
    cls = jnp.broadcast_to(params['class_embedding'][None, None, :].astype(jnp.float32),
                           (B, 1, D))
    x_emb = jnp.concatenate([cls, x_emb], axis=1)
    x_emb = x_emb + params['positional_embedding'][None].astype(jnp.float32)

    # incorporate_prompt (non-parallel path): concat prompt after the prefix tokens
    if prompt is not None:
        prom = jnp.broadcast_to(prompt.astype(x_emb.dtype), (B, prompt.shape[1], D))
        x_emb = jnp.concatenate([x_emb[:, :prefix_len, :], prom], axis=1)
    # TODO(synk): incorporate_prompt_parallel (pop_size-stacked prompts) not implemented;
    # the module defaults to parallel=False.

    S = x_emb.shape[1]
    Sp = _round_up(S, 8)               # pad sequence to a sublane multiple;
    if Sp != S:                        # padded key positions are masked in attention
        x_emb = jnp.pad(x_emb, ((0, 0), (0, Sp - S), (0, 0)))

    # ln_pre (row-tiled); residual stream carried in f32 between fused kernels.
    x_cur = layernorm(x_emb.reshape(B * Sp, D),
                      params['ln_pre_g'], params['ln_pre_b'],
                      out_dtype=jnp.float32).reshape(B, Sp, D)

    # transformer (ResidualAttentionBlocks); the (N,L,D)<->(L,N,D) permutes are
    # mathematical no-ops since attention mixes only within a batch element.
    for blk in params['blocks']:
        x_cur = attn_block(x_cur, blk['ln1_g'], blk['ln1_b'],
                           blk['wqkv'], blk['bqkv'], blk['wo'], blk['bo'],
                           num_heads=num_heads, seq_valid=S)
        x_cur = mlp_block(x_cur.reshape(B * Sp, D), blk['ln2_g'], blk['ln2_b'],
                          blk['w1'], blk['b1'], blk['w2'], blk['b2']).reshape(B, Sp, D)

    # fused ln_post + final projection on the class token
    return ln_proj(x_cur[:, 0, :], params['ln_post_g'], params['ln_post_b'],
                   params['proj'], out_dtype=jnp.float32)


# ----------------------------------------------------------------------------
if __name__ == "__main__":
    # Small CLIP-visual-like config
    B, C, RES, P = 2, 3, 16, 4
    WIDTH, HEADS, LAYERS, OUT_DIM = 32, 4, 2, 16
    PREFIX_LEN = (RES // P) ** 2 + 1          # 17
    N_PROMPT = 4

    key = jax.random.PRNGKey(0)
    kx, kp, kw = jax.random.split(key, 3)
    x = jax.random.normal(kx, (B, C, RES, RES), jnp.float32)
    prompt = 0.02 * jax.random.normal(kp, (1, N_PROMPT, WIDTH), jnp.float32)

    params = init_params(kw, width=WIDTH, layers=LAYERS, heads=HEADS,
                         patch_size=P, in_ch=C, prefix_len=PREFIX_LEN,
                         output_dim=OUT_DIM)

    out = vision_encoder_forward(x, prompt, params, patch_size=P, num_heads=HEADS)
    out = jax.block_until_ready(out)
    assert out.shape == (B, OUT_DIM), out.shape
    assert jnp.all(jnp.isfinite(out))
    print("KERNEL_OK")
</pallas_src>

<mosaic_0001>
module attributes {stable_mosaic.version = 11 : i64} {
  func.func @_k(%arg0: i32, %arg1: memref<8x128xf32, #tpu.memory_space<vmem>>, %arg2: memref<8x128xf32, #tpu.memory_space<vmem>>) attributes {dimension_semantics = [#tpu.dimension_semantics<arbitrary>], iteration_bounds = array<i64: 2>, scalar_prefetch = 0 : i64, scratch_operands = 0 : i64, tpu.core_type = #tpu.core_type<tc>, window_params = [{pipeline_mode = #tpu.pipeline_mode<synchronous>, transform_indices = @transform_0, window_bounds = array<i64: 8, 128>}, {transform_indices = @transform_1, window_bounds = array<i64: 8, 128>}]} {
    %c0 = arith.constant 0 : index
    %c0_0 = arith.constant 0 : index
    %0 = vector.load %arg1[%c0, %c0_0] : memref<8x128xf32, #tpu.memory_space<vmem>>, vector<8x128xf32>
    %cst = arith.constant 1.000000e+00 : f32
    %1 = vector.broadcast %cst : f32 to vector<8x128xf32>
    %2 = arith.addf %0, %1 : vector<8x128xf32>
    %c0_1 = arith.constant 0 : index
    %c0_2 = arith.constant 0 : index
    %3 = vector.load %arg2[%c0_1, %c0_2] : memref<8x128xf32, #tpu.memory_space<vmem>>, vector<8x128xf32>
    tpu.vector_store %arg2[%c0_1, %c0_2], %2 {strides = array<i32>} : memref<8x128xf32, #tpu.memory_space<vmem>>, vector<8x128xf32>,
    return
  }
  func.func @transform_0(%arg0: i32) -> (i32, i32) {
    %c0_i32 = arith.constant 0 : i32
    %c0_i32_0 = arith.constant 0 : i32
    %c0_i32_1 = arith.constant 0 : i32
    return %c0_i32, %c0_i32_0 : i32, i32
  }
  func.func @transform_1(%arg0: i32) -> (i32, i32) {
    %c0_i32 = arith.constant 0 : i32
    %c0_i32_0 = arith.constant 0 : i32
    return %arg0, %c0_i32 : i32, i32
  }
}

module attributes {stable_mosaic.version = 11 : i64} {
  func.func @_matmul_kernel(%arg0: i32, %arg1: i32, %arg2: i32, %arg3: memref<32x128xbf16, #tpu.memory_space<vmem>>, %arg4: memref<128x128xbf16, #tpu.memory_space<vmem>>, %arg5: memref<32x128xf32, #tpu.memory_space<vmem>>, %arg6: memref<32x128xf32, #tpu.memory_space<vmem>>) attributes {dimension_semantics = [#tpu.dimension_semantics<parallel>, #tpu.dimension_semantics<parallel>, #tpu.dimension_semantics<arbitrary>], iteration_bounds = array<i64: 1, 1, 1>, scalar_prefetch = 0 : i64, scratch_operands = 1 : i64, tpu.core_type = #tpu.core_type<tc>, window_params = [{transform_indices = @transform_0, window_bounds = array<i64: 32, 128>}, {transform_indices = @transform_1, window_bounds = array<i64: 128, 128>}, {transform_indices = @transform_2, window_bounds = array<i64: 32, 128>}]} {
    %c0_i32 = arith.constant 0 : i32
    %0 = arith.cmpi eq, %arg2, %c0_i32 : i32
    %1 = arith.extui %0 : i1 to i32
    %c0_i32_0 = arith.constant 0 : i32
    %2 = arith.cmpi ne, %1, %c0_i32_0 : i32
    scf.if %2 {
      %cst_10 = arith.constant 0.000000e+00 : f32
      %12 = vector.broadcast %cst_10 : f32 to vector<32x128xf32>
      %c0_11 = arith.constant 0 : index
      %c0_12 = arith.constant 0 : index
      %13 = vector.load %arg6[%c0_11, %c0_12] : memref<32x128xf32, #tpu.memory_space<vmem>>, vector<32x128xf32>
      tpu.vector_store %arg6[%c0_11, %c0_12], %12 {strides = array<i32>} : memref<32x128xf32, #tpu.memory_space<vmem>>, vector<32x128xf32>,
    } else {
    }
    %c0 = arith.constant 0 : index
    %c0_1 = arith.constant 0 : index
    %3 = vector.load %arg6[%c0, %c0_1] : memref<32x128xf32, #tpu.memory_space<vmem>>, vector<32x128xf32>
    %c0_2 = arith.constant 0 : index
    %c0_3 = arith.constant 0 : index
    %4 = vector.load %arg3[%c0_2, %c0_3] : memref<32x128xbf16, #tpu.memory_space<vmem>>, vector<32x128xbf16>
    %c0_4 = arith.constant 0 : index
    %c0_5 = arith.constant 0 : index
    %5 = vector.load %arg4[%c0_4, %c0_5] : memref<128x128xbf16, #tpu.memory_space<vmem>>, vector<128x128xbf16>
    %cst = arith.constant dense<0.000000e+00> : vector<32x128xf32>
    %6 = tpu.matmul %4, %5, %cst {dimension_numbers = #tpu.dot_dimension_numbers<[1], [0], [0], [1], [0, 0, 1, 1], [], []>} : vector<32x128xbf16>, vector<128x128xbf16>, vector<32x128xf32> -> vector<32x128xf32>
    %7 = arith.addf %3, %6 : vector<32x128xf32>
    %c0_6 = arith.constant 0 : index
    %c0_7 = arith.constant 0 : index
    %8 = vector.load %arg6[%c0_6, %c0_7] : memref<32x128xf32, #tpu.memory_space<vmem>>, vector<32x128xf32>
    tpu.vector_store %arg6[%c0_6, %c0_7], %7 {strides = array<i32>} : memref<32x128xf32, #tpu.memory_space<vmem>>, vector<32x128xf32>,
    %c0_i32_8 = arith.constant 0 : i32
    %9 = arith.cmpi eq, %arg2, %c0_i32_8 : i32
    %10 = arith.extui %9 : i1 to i32
    %c0_i32_9 = arith.constant 0 : i32
    %11 = arith.cmpi ne, %10, %c0_i32_9 : i32
    scf.if %11 {
      %c0_10 = arith.constant 0 : index
      %c0_11 = arith.constant 0 : index
      %12 = vector.load %arg6[%c0_10, %c0_11] : memref<32x128xf32, #tpu.memory_space<vmem>>, vector<32x128xf32>
      %c0_12 = arith.constant 0 : index
      %c0_13 = arith.constant 0 : index
      %13 = vector.load %arg5[%c0_12, %c0_13] : memref<32x128xf32, #tpu.memory_space<vmem>>, vector<32x128xf32>
      tpu.vector_store %arg5[%c0_12, %c0_13], %12 {strides = array<i32>} : memref<32x128xf32, #tpu.memory_space<vmem>>, vector<32x128xf32>,
    } else {
    }
    return
  }
  func.func @transform_0(%arg0: i32, %arg1: i32, %arg2: i32) -> (i32, i32) {
    %c0_i32 = arith.constant 0 : i32
    return %arg0, %arg2 : i32, i32
  }
  func.func @transform_1(%arg0: i32, %arg1: i32, %arg2: i32) -> (i32, i32) {
    %c0_i32 = arith.constant 0 : i32
    return %arg2, %arg1 : i32, i32
  }
  func.func @transform_2(%arg0: i32, %arg1: i32, %arg2: i32) -> (i32, i32) {
    %c0_i32 = arith.constant 0 : i32
    return %arg0, %arg1 : i32, i32
  }
}

</mosaic_0001>

<bundles_post_ra>
// kernel: tpu_custom_call.1
= control target key start
LH: loop header
LB: loop body
LE: loop exit
PB: predicated region body
PF: predicated region fallthrough
CT: control target
= control target key end

     0   :  { %6 = vsyncpa [#allocation3], 0  ;;  %s482_s0 = inlined_call_operand.hbm [shape: f32[8,128], index: 0, kind: input, shape index: {}]   ;;  %s483_s1 = inlined_call_operand.hbm [shape: f32[16,128], index: 1, kind: output, shape index: {}]  }
   0x1   :  { %7 = vsyncpa [#allocation4], 0 }
   0x2   :  { %9 = vsyncpa [#allocation4 + $0x1], 0  ;;  %s352_s6 = smov 0   ;;  %s354_s7 = smov 0  }
   0x3   :  { %s356_s8 = smov 0   ;;  %s358_s9 = smov 0  }
   0x4 LB: > { %s373_s10 = sadd.s32 4294967295, %s338_s9   ;;  %s184_s11 = sadd.s32 4294967294, %s338_s9   ;;  %s338_s9 = sphi %s358_s9, %s499_s9   ;;  %s334_s8 = sphi %s356_s8, %s498_s8   ;;  %s330_s7 = sphi %s354_s7, %s497_s7   ;;  %s326_s6 = sphi %s352_s6, %s496_s6  }
   0x5   : > { %s377_s12 = sadd.s32 1, %s338_s9   ;;  %s43_s13 = sadd.s32 1, %s334_s8 }
   0x6   : > { %s40_s14 = ssub.s32 %s338_s9, %s377_s12  ;;  %p53_p0 = scmp.ne.s32.totalorder %s334_s8, %s330_s7 }
   0x7   : > { %p41_p1 = scmp.eq.s32.totalorder %s40_s14, 0  ;;  %p54_p2 = scmp.eq.s32.totalorder %s373_s10, 1 }
   0x8   : > { %p59_p3 = scmp.ne.s32.totalorder %s330_s7, %s326_s6  ;;  %p60_p4 = scmp.eq.s32.totalorder %s184_s11, 1 }
   0x9   : > { %s388_s15 = scalar_select %p41_p1, %s334_s8, %s43_s13  }
   0xa   : > { %p390_p5 = por %p54_p2, %p53_p0  ;;  %p394_p6 = por %p60_p4, %p59_p3 }
   0xb   : > { %p185_p7 = scmp.ge.s32.totalorder %s338_s9, 1  ;;  %p67_p8 = scmp.lt.s32.totalorder %s338_s9, 3 }
   0xc   : > { %s487_s16 = scalar_select %p390_p5, 1, 0 }
   0xd   : > { %s488_s17 = scalar_select %p394_p6, 1, 0 }
   0xe   : > { %p484_p9 = scmp.eq.s32.totalorder %s373_s10, 0  ;;  %p401_p10 = pnand %p185_p7, %p67_p8 }
   0xf   : > { %s340_s19 = smov [#allocation2]   ;;  %s244_s24 = scalar_lea.hbm %s482_s0, 128 }
  0x10   : > { %s489_s18 = scalar_select %p401_p10, 1, 0 }
  0x11   : > { %s80_s20 = sshll.u32 %s340_s19, 4  ;;  %p200_p11 = pneg %p401_p10  ;;  %s81_s20 = int_to_ptr.vmem [resolvable:$true] %s80_s20 }
  0x12   : > { %p245_p13 = scmp.ne.s32.totalorder %s482_s0, %s244_s24  ;;  %p251_p3 = scmp.lt.u32.totalorder %s244_s24, %s482_s0 }
  0x13   : > { %p409_p12 = pnand %p484_p9, %p200_p11 }
  0x15   : > { %p246_p0 = pneg %p409_p12 }
  0x17   : > { %p247_p1 = pnand %p246_p0, %p245_p13 }
  0x19   : > { %p248_p2 = pneg %p247_p1 }
  0x1b   : > { %p253_p4 = pnand %p251_p3, %p248_p2 }
  0x1d   : > { %256 = shalt.err (!%p253_p4)
}
  0x1e   : > { %s257_s29 = scalar_lea.vmem %s81_s20, 128  ;;  %p265_p9 = scmp.lt.s32.totalorder %s81_s20, %s81_s20 }
  0x1f   : > { %p258_p7 = scmp.ne.s32.totalorder %s81_s20, %s257_s29  ;;  %p266_p6 = scmp.lt.s32.totalorder %s257_s29, %s257_s29 }
  0x21   : > { %p260_p8 = pnand %p258_p7, %p246_p0  ;;  %p267_p5 = por %p266_p6, %p265_p9 }
  0x23   : > { %p261_p11 = pneg %p260_p8 }
  0x25   : > { %p268_p10 = pnand %p267_p5, %p261_p11 }
  0x27   : > { %271 = shalt.err (!%p268_p10)
}
  0x28   : > { %203 = dma.hbm_to_vmem [thread:$0]  (!%p409_p12), %s482_s0, 128, %s81_s20, [#allocation3]  }
  0x29   : > { %p491_p13 = scmp.ne.s32.totalorder %s489_s18, 0 }
  0x2a   : > { %p492_p1 = scmp.eq.s32.totalorder (!%p491_p13), %s373_s10, 0 }
  0x2b   : > { %93 = sbr.rel (%p491_p13) target bundleno = 77 (0x4d), region = 24 }
  0x32   : > { %317 = dma.done.wait (%p492_p1), [#allocation3], 128   ;;  %p493_p0 = pmov %p492_p1 }
  0x33   : > { %s105_s3 = sand.u32 1, %s330_s7   ;;  %s191_s13 = sshll.u32 %s373_s10, 7  ;;  %v108_v0 = vld [vmem:[#allocation2] sm:$0xff] }
  0x34   : > { %319 = vsyncadd (%p493_p0), [#allocation3], 4294967168  ;;  %s189_s4 = sshll.u32 %s105_s3, 3  ;;  %v109_v1 = vadd.f32 1.0, %v108_v0  ;;  %s442_s19 = scalar_lea.hbm %s483_s1, %s191_s13 }
  0x35   : > { %s107_s5 = scalar_lea.vmem [#allocation5], %s189_s4  ;;  %s112_s20 = scalar_lea.sflag [#allocation4], %s105_s3 }
  0x36   : > { %s125_s11 = sshll.u32 %s107_s5, 4  ;;  %110 = vst [vmem:[%s107_s5] sm:$0xff] %v109_v1  ;;  %p494_p6 = scmp.ne.s32.totalorder %s487_s16, 0  ;;  %s437_s11 = int_to_ptr.vmem [resolvable:$true] %s125_s11 }
  0x37   : > { %s272_s21 = scalar_lea.vmem %s437_s11, 128  ;;  %s341_s10 = smov [#allocation5]  }
  0x38   : > { %p273_p5 = scmp.ne.s32.totalorder %s437_s11, %s272_s21  ;;  %s276_s22 = sshll.u32 %s341_s10, 4  ;;  %s277_s22 = int_to_ptr.vmem [resolvable:$false] %s276_s22 }
  0x39   : > { %s278_s23 = scalar_lea.vmem %s277_s22, 256  ;;  %p279_p12 = scmp.lt.s32.totalorder %s437_s11, %s277_s22 }
  0x3a   : > { %p274_p9 = pnand %p273_p5, %p494_p6  ;;  %p280_p2 = scmp.lt.s32.totalorder %s278_s23, %s272_s21 }
  0x3c   : > { %p275_p10 = pneg %p274_p9  ;;  %p281_p3 = por %p280_p2, %p279_p12 }
  0x3e   : > { %p282_p4 = pnand %p281_p3, %p275_p10 }
  0x40   : > { %285 = shalt.err (!%p282_p4)
}
  0x41   : > { %s286_s24 = scalar_lea.hbm %s442_s19, 128  ;;  %s290_s27 = scalar_lea.hbm %s483_s1, 256 }
  0x42   : > { %p287_p7 = scmp.ne.s32.totalorder %s442_s19, %s286_s24  ;;  %p291_p13 = scmp.lt.u32.totalorder %s442_s19, %s483_s1 }
  0x43   : > { %p292_p1 = scmp.lt.u32.totalorder %s290_s27, %s286_s24  ;;  %p294_p5 = scmp.lt.u32.totalorder %s286_s24, %s442_s19 }
  0x44   : > { %p288_p8 = pnand %p287_p7, %p494_p6 }
  0x45   : > { %p293_p0 = por %p292_p1, %p291_p13 }
  0x46   : > { %p289_p11 = pneg %p288_p8 }
  0x47   : > { %p295_p9 = por %p294_p5, %p293_p0 }
  0x49   : > { %p296_p10 = pnand %p295_p9, %p289_p11 }
  0x4b   : > { %299 = shalt.err (!%p296_p10)
}
  0x4c   : > { %198 = dma.vmem_to_hbm [thread:$0]  (%p494_p6), %s437_s11, 128, %s442_s19, %s112_s20  }
  0x4d PF: > { %p210_p12 = scmp.ge.s32.totalorder %s338_s9, 2  ;;  %s137_s30 = sand.u32 1, %s326_s6  }
  0x4e   : > { %p495_p2 = scmp.ne.s32.totalorder %s488_s17, 0  ;;  %s138_s2 = scalar_lea.sflag [#allocation4], %s137_s30 }
  0x50   : > { %p205_p3 = pnand %p210_p12, %p495_p2 }
  0x52   : > { %321 = dma.done.wait (!%p205_p3), %s138_s2, 128  }
  0x53   : > { %323 = vsyncadd (!%p205_p3), %s138_s2, 4294967168  ;;  %p12_p4 = scmp.ge.s32.totalorder %s377_s12, 4   ;;  %s496_s6 = smov %s330_s7 }
  0x54   : > { %s497_s7 = smov %s334_s8  ;;  %s498_s8 = smov %s388_s15 }
  0x55   : > { %s499_s9 = smov %s377_s12  ;;  %14 = sbr.rel (!%p12_p4) target bundleno = 4 (0x4), region = 61 }
  0x5c   :  { %143 = vsyncpa [#allocation3], 1 }
  0x5d   :  { %145 = vsyncpa [#allocation3 + $0x1], 1 }
  0x5e   :  { %146 = vsyncpa [#allocation4], 1 }
  0x5f   :  { %148 = vsyncpa [#allocation4 + $0x1], 1 }

// kernel: tpu_custom_call.1
= control target key start
LH: loop header
LB: loop body
LE: loop exit
PB: predicated region body
PF: predicated region fallthrough
CT: control target
= control target key end

     0   :  { %7 = vsyncpa [#allocation4], 0  ;;  %s406_s0 = inlined_call_operand.hbm [shape: bf16[32,128], index: 0, kind: input, shape index: {}]   ;;  %s407_s1 = inlined_call_operand.hbm [shape: bf16[128,128], index: 1, kind: input, shape index: {}]   ;;  %s408_s2 = inlined_call_operand.hbm [shape: f32[32,128], index: 2, kind: output, shape index: {}]  }
   0x1   :  { %8 = vsyncpa [#allocation7], 0 }
   0x2   :  { %9 = vsyncpa [#allocation5], 0  ;;  %s348_s9 = smov [#allocation3]   ;;  %s276_s13 = scalar_lea.hbm %s406_s0, 256 }
   0x3   :  { %s15_s10 = sshll.u32 %s348_s9, 4  ;;  %p277_p0 = scmp.ne.s32.totalorder %s406_s0, %s276_s13  ;;  %s16_s10 = int_to_ptr.vmem [resolvable:$true] %s15_s10 }
   0x4   :  { %p280_p1 = scmp.lt.u32.totalorder %s276_s13, %s406_s0 }
   0x6   :  { %p282_p2 = pnand %p280_p1, %p277_p0 }
   0x8   :  { %285 = shalt.err (!%p282_p2)
}
   0x9   :  { %s286_s18 = scalar_lea.vmem %s16_s10, 256  ;;  %p291_p4 = scmp.lt.s32.totalorder %s16_s10, %s16_s10 }
   0xa   :  { %p287_p3 = scmp.ne.s32.totalorder %s16_s10, %s286_s18  ;;  %p292_p5 = scmp.lt.s32.totalorder %s286_s18, %s286_s18 }
   0xc   :  { %p293_p6 = por %p292_p5, %p291_p4 }
   0xe   :  { %p294_p7 = pnand %p293_p6, %p287_p3 }
  0x10   :  { %297 = shalt.err (!%p294_p7)
}
  0x11   :  { %s349_s19 = smov 64   ;;  %s350_s20 = smov 4  }
  0x12   :  { %21 = dma.hbm_to_vmem [thread:$0]  %s406_s0, 256, %s16_s10, [#allocation4], %s349_s19, %s349_s19, %s350_s20  }
  0x13   :  { %s351_s23 = smov [#allocation6]   ;;  %s298_s27 = scalar_lea.hbm %s407_s1, 1024 }
  0x14   :  { %s27_s24 = sshll.u32 %s351_s23, 4  ;;  %p299_p8 = scmp.ne.s32.totalorder %s407_s1, %s298_s27  ;;  %s28_s24 = int_to_ptr.vmem [resolvable:$true] %s27_s24 }
  0x15   :  { %p302_p9 = scmp.lt.u32.totalorder %s298_s27, %s407_s1 }
  0x17   :  { %p304_p10 = pnand %p302_p9, %p299_p8 }
  0x19   :  { %307 = shalt.err (!%p304_p10)
}
  0x1a   :  { %s308_s4 = scalar_lea.vmem %s28_s24, 1024  ;;  %p313_p12 = scmp.lt.s32.totalorder %s28_s24, %s28_s24 }
  0x1b   :  { %p309_p11 = scmp.ne.s32.totalorder %s28_s24, %s308_s4  ;;  %p314_p13 = scmp.lt.s32.totalorder %s308_s4, %s308_s4 }
  0x1d   :  { %p315_p0 = por %p314_p13, %p313_p12 }
  0x1f   :  { %p316_p1 = pnand %p315_p0, %p309_p11 }
  0x21   :  { %319 = shalt.err (!%p316_p1)
}
  0x22   :  { %33 = dma.hbm_to_vmem [thread:$0]  %s407_s1, 1024, %s28_s24, [#allocation7], %s349_s19, %s349_s19, %s350_s20  }
  0x23   :  { %342 = dma.done.wait [#allocation4], 256  }
  0x24   :  { %343 = vsyncadd [#allocation4], 4294967040 }
  0x25   :  { %344 = dma.done.wait [#allocation7], 1024  }
  0x26   :  { %345 = vsyncadd [#allocation7], 4294966272  ;;  %v266_v0 = vld [vmem:[#allocation6] sm:$0xff]   ;;  %v267_v1 = vld [vmem:[#allocation6 + $0x8] sm:$0xff]   ;;  %s352_s1 = smov [#allocation8]  }
  0x27   :  { %239 = vmatprep.subr.bf16.mxu0 %v266_v0  ;;  %v268_v2 = vld [vmem:[#allocation6 + $0x10] sm:$0xff]   ;;  %v269_v3 = vld [vmem:[#allocation6 + $0x18] sm:$0xff]   ;;  %v270_v5 = vld [vmem:[#allocation6 + $0x20] sm:$0xff]   ;;  %s206_s6 = sshll.u32 %s352_s1, 4  ;;  %s207_s6 = int_to_ptr.vmem [resolvable:$true] %s206_s6 }
  0x28   :  { %240 = vmatpush3.bf16.msra.mxu0 %v266_v0  ;;  %v274_v4 = vld [vmem:[#allocation3] sm:$0xff]   ;;  %v271_v6 = vld [vmem:[#allocation6 + $0x28] sm:$0xff]   ;;  %v273_v8 = vld [vmem:[#allocation6 + $0x38] sm:$0xff]   ;;  %s320_s7 = scalar_lea.vmem %s207_s6, 512  ;;  %p325_p3 = scmp.lt.s32.totalorder %s207_s6, %s207_s6 }
  0x29   :  { %241 = vmatprep.subr.bf16.mxu0 %v267_v1  ;;  %255 = vmatprep.mubr.bf16.mxu0 %v274_v4  ;;  %v272_v7 = vld [vmem:[#allocation6 + $0x30] sm:$0xff]   ;;  %v275_v9 = vld [vmem:[#allocation3 + $0x8] sm:$0xff]   ;;  %p321_p2 = scmp.ne.s32.totalorder %s207_s6, %s320_s7  ;;  %p326_p4 = scmp.lt.s32.totalorder %s320_s7, %s320_s7 }
  0x2b   :  { %p327_p5 = por %p326_p4, %p325_p3 }
  0x2c   :  { %242 = vmatpush3.bf16.msra.mxu0 %v267_v1 }
  0x2d   :  { %243 = vmatprep.subr.bf16.mxu0 %v268_v2  ;;  %p328_p6 = pnand %p327_p5, %p321_p2 }
  0x30   :  { %244 = vmatpush3.bf16.msra.mxu0 %v268_v2 }
  0x31   :  { %245 = vmatprep.subr.bf16.mxu0 %v269_v3 }
  0x34   :  { %246 = vmatpush3.bf16.msra.mxu0 %v269_v3 }
  0x35   :  { %247 = vmatprep.subr.bf16.mxu0 %v270_v5 }
  0x38   :  { %248 = vmatpush3.bf16.msra.mxu0 %v270_v5 }
  0x39   :  { %249 = vmatprep.subr.bf16.mxu0 %v271_v6 }
  0x3c   :  { %250 = vmatpush3.bf16.msra.mxu0 %v271_v6 }
  0x3d   :  { %251 = vmatprep.subr.bf16.mxu0 %v272_v7 }
  0x40   :  { %252 = vmatpush3.bf16.msra.mxu0 %v272_v7 }
  0x41   :  { %253 = vmatprep.subr.bf16.mxu0 %v273_v8 }
  0x44   :  { %254 = vmatpush3.bf16.msra.mxu0 %v273_v8 }
  0x47   :  { %256 = vmatmul.mubr.bf16.vlgmr.msra.gmra.mrb[0].mxu0 %v275_v9 }
 0x11a   :  { %v257_v10 = vpop.f32.mrb[0].mxu0 }
 0x11b   :  { %199 = vst [vmem:[#allocation8 + $0x10] sm:$0xff] %v257_v10  ;;  %v167_v11 = vpop.f32.mrb[1].mxu0 }
 0x11c   :  { %197 = vst [vmem:[#allocation8] sm:$0xff] %v167_v11  ;;  %v258_v12 = vpop.f32.mrb[2].mxu0 }
 0x11d   :  { %200 = vst [vmem:[#allocation8 + $0x18] sm:$0xff] %v258_v12  ;;  %v170_v13 = vpop.f32.mrb[3].mxu0 }
 0x11e   :  { %198 = vst [vmem:[#allocation8 + $0x8] sm:$0xff] %v170_v13 }
 0x11f   :  { %331 = shalt.err (!%p328_p6)
}
 0x120   :  { %s332_s10 = scalar_lea.hbm %s408_s2, 512 }
 0x121   :  { %p333_p7 = scmp.ne.s32.totalorder %s408_s2, %s332_s10  ;;  %p336_p8 = scmp.lt.u32.totalorder %s332_s10, %s408_s2 }
 0x123   :  { %p338_p9 = pnand %p336_p8, %p333_p7 }
 0x125   :  { %341 = shalt.err (!%p338_p9)
}
 0x126   :  { %s353_s15 = smov 128   ;;  %s354_s16 = smov 8  }
 0x127   :  { %212 = dma.vmem_to_hbm [thread:$0]  %s207_s6, 512, %s408_s2, [#allocation5], %s353_s15, %s353_s15, %s354_s16  }
 0x128   :  { %346 = dma.done.wait [#allocation5], 512  }
 0x129   :  { %347 = vsyncadd [#allocation5], 4294966784 }
 0x12a   :  { %216 = vsyncpa [#allocation4], 1 }
 0x12b   :  { %217 = vsyncpa [#allocation7], 1 }
 0x12c   :  { %218 = vsyncpa [#allocation5], 1 }

</bundles_post_ra>
